<compile_context>
chip_gen: v6e
topology: v6e:2x2x1
jax: 0.10.0
libtpu: 0.0.40
codegen_flags: <defaults>
</compile_context>

<pallas_src>
from functools import partial

import jax
import jax.numpy as jnp
from jax.experimental import pallas as pl
from jax.experimental.pallas import tpu as pltpu


def _round_up(x, m):
    return (x + m - 1) // m * m


def _per_sample_ce(logits, tgt):
    """Per-sample softmax cross-entropy in the transposed layout.

    logits: (C, T) float32 (class on sublanes, sample on lanes)
    tgt:    (1, T) int32
    returns (1, T) float32 per-sample loss.
    """
    c, t = logits.shape
    if c == 2:
        # Closed-form 2-class logsumexp: max(a,b) + log(1 + exp(-|a-b|)).
        a = logits[0:1, :]
        b = logits[1:2, :]
        lse = jnp.maximum(a, b) + jnp.log(1.0 + jnp.exp(-jnp.abs(a - b)))
        tgt_logit = jnp.where(tgt == 0, a, b)
        return lse - tgt_logit
    m = jnp.max(logits, axis=0, keepdims=True)                             # (1, T)
    lse = m + jnp.log(jnp.sum(jnp.exp(logits - m), axis=0, keepdims=True))  # (1, T)
    row = jax.lax.broadcasted_iota(jnp.int32, (c, t), 0)                   # (C, T)
    onehot = (row == tgt).astype(jnp.float32)                              # (C, T)
    tgt_logit = jnp.sum(logits * onehot, axis=0, keepdims=True)            # (1, T)
    return lse - tgt_logit


def _age_gender_loss_kernel(age_logits_ref, age_tgt_ref,
                            gen_logits_ref, gen_tgt_ref,
                            out_ref, acc_ref, *, n_valid):
    pid = pl.program_id(0)
    tile_n = acc_ref.shape[1]

    @pl.when(pid == 0)
    def _():
        acc_ref[...] = jnp.zeros_like(acc_ref)

    # Cast to f32 in-kernel (hidden under the DMA; keeps HBM traffic at the
    # input's native width).
    age_logits = age_logits_ref[...].astype(jnp.float32)
    gen_logits = gen_logits_ref[...].astype(jnp.float32)

    loss_age = _per_sample_ce(age_logits, age_tgt_ref[...])   # (1, T)
    loss_gen = _per_sample_ce(gen_logits, gen_tgt_ref[...])   # (1, T)

    # Mask batch-padding lanes of the (possibly ragged) last tile so they do
    # not contribute to the sum.
    lane = jax.lax.broadcasted_iota(jnp.int32, (1, tile_n), 1)
    valid = (pid * tile_n + lane) < n_valid
    acc_ref[...] += jnp.where(valid, loss_age + loss_gen, 0.0)

    @pl.when(pid == pl.num_programs(0) - 1)
    def _():
        # One cross-lane reduce + mean at finalize; scalar lands in SMEM.
        out_ref[0, 0] = jnp.sum(acc_ref[...]) * (1.0 / n_valid)


def age_gender_loss(y_age, y_gender, y_age_pred, y_gender_pred, *, tile_n=8192):
    """Mirrors Age_Gender_Loss.forward:
       F.cross_entropy(y_age_pred, y_age) + F.cross_entropy(y_gender_pred, y_gender)
    """
    n, c_age = y_age_pred.shape
    _, c_gen = y_gender_pred.shape

    # Lane-dense batch tile: multiple of 128, clamped to the (padded) batch.
    tile_n = max(128, min(tile_n, _round_up(n, 128)))
    n_pad = _round_up(n, tile_n)
    num_tiles = n_pad // tile_n

    # Layout plumbing in the wrapper: class-on-sublane / batch-on-lane, native
    # logits dtype, (1, N) int32 targets.  Padding lanes are masked in-kernel.
    age_logits = jnp.pad(y_age_pred, ((0, n_pad - n), (0, 0))).T      # (C_age, n_pad)
    gen_logits = jnp.pad(y_gender_pred, ((0, n_pad - n), (0, 0))).T   # (C_gen, n_pad)
    age_tgt = jnp.pad(y_age.astype(jnp.int32), (0, n_pad - n)).reshape(1, n_pad)
    gen_tgt = jnp.pad(y_gender.astype(jnp.int32), (0, n_pad - n)).reshape(1, n_pad)

    kernel = partial(_age_gender_loss_kernel, n_valid=n)

    out = pl.pallas_call(
        kernel,
        out_shape=jax.ShapeDtypeStruct((1, 1), jnp.float32),
        grid_spec=pltpu.PrefetchScalarGridSpec(
            num_scalar_prefetch=0,
            grid=(num_tiles,),
            in_specs=[
                pl.BlockSpec((c_age, tile_n), lambda i: (0, i)),  # age logits
                pl.BlockSpec((1, tile_n), lambda i: (0, i)),      # age targets
                pl.BlockSpec((c_gen, tile_n), lambda i: (0, i)),  # gender logits
                pl.BlockSpec((1, tile_n), lambda i: (0, i)),      # gender targets
            ],
            out_specs=pl.BlockSpec((1, 1), lambda i: (0, 0),
                                   memory_space=pltpu.MemorySpace.SMEM),
            scratch_shapes=[pltpu.VMEM((1, tile_n), jnp.float32)],
        ),
        compiler_params=pltpu.CompilerParams(
            dimension_semantics=("arbitrary",)),
    )(age_logits, age_tgt, gen_logits, gen_tgt)
    return out[0, 0]


def _reference(y_age, y_gender, y_age_pred, y_gender_pred):
    # Plain-JAX reference (equivalent to F.cross_entropy with mean reduction).
    def ce(logits, tgt):
        logp = jax.nn.log_softmax(logits.astype(jnp.float32), axis=-1)
        return -jnp.mean(jnp.take_along_axis(logp, tgt[:, None], axis=-1))
    return ce(y_age_pred, y_age) + ce(y_gender_pred, y_gender)


if __name__ == "__main__":
    key = jax.random.PRNGKey(0)
    k1, k2, k3, k4 = jax.random.split(key, 4)

    N = 8            # batch
    C_AGE = 8        # number of age buckets
    C_GENDER = 2     # number of gender classes

    y_age_pred = jax.random.normal(k1, (N, C_AGE), dtype=jnp.float32)
    y_gender_pred = jax.random.normal(k2, (N, C_GENDER), dtype=jnp.float32)
    y_age = jax.random.randint(k3, (N,), 0, C_AGE, dtype=jnp.int32)
    y_gender = jax.random.randint(k4, (N,), 0, C_GENDER, dtype=jnp.int32)

    loss = age_gender_loss(y_age, y_gender, y_age_pred, y_gender_pred)
    loss = jax.block_until_ready(loss)

    ref = _reference(y_age, y_gender, y_age_pred, y_gender_pred)
    assert jnp.allclose(loss, ref, atol=1e-5, rtol=1e-5), (loss, ref)

    print("KERNEL_OK")
</pallas_src>

<mosaic_0001>
module attributes {stable_mosaic.version = 11 : i64} {
  func.func @_age_gender_loss_kernel(%arg0: i32, %arg1: memref<8x128xf32, #tpu.memory_space<vmem>>, %arg2: memref<1x128xi32, #tpu.memory_space<vmem>>, %arg3: memref<2x128xf32, #tpu.memory_space<vmem>>, %arg4: memref<1x128xi32, #tpu.memory_space<vmem>>, %arg5: memref<1x1xf32, #tpu.memory_space<smem>>, %arg6: memref<1x128xf32, #tpu.memory_space<vmem>>) attributes {dimension_semantics = [#tpu.dimension_semantics<arbitrary>], iteration_bounds = array<i64: 1>, scalar_prefetch = 0 : i64, scratch_operands = 1 : i64, tpu.core_type = #tpu.core_type<tc>, window_params = [{transform_indices = @transform_0, window_bounds = array<i64: 8, 128>}, {transform_indices = @transform_1, window_bounds = array<i64: 1, 128>}, {transform_indices = @transform_2, window_bounds = array<i64: 2, 128>}, {transform_indices = @transform_3, window_bounds = array<i64: 1, 128>}, {transform_indices = @transform_4, window_bounds = array<i64: 1, 1>}]} {
    %c0_i32 = arith.constant 0 : i32
    %0 = arith.cmpi eq, %arg0, %c0_i32 : i32
    %1 = arith.extui %0 : i1 to i32
    %c0_i32_0 = arith.constant 0 : i32
    %2 = arith.cmpi ne, %1, %c0_i32_0 : i32
    scf.if %2 {
      %cst_20 = arith.constant 0.000000e+00 : f32
      %56 = vector.broadcast %cst_20 : f32 to vector<1x128xf32>
      %c0_21 = arith.constant 0 : index
      %c0_22 = arith.constant 0 : index
      %57 = vector.load %arg6[%c0_21, %c0_22] : memref<1x128xf32, #tpu.memory_space<vmem>>, vector<1x128xf32>
      tpu.vector_store %arg6[%c0_21, %c0_22], %56 {strides = array<i32>} : memref<1x128xf32, #tpu.memory_space<vmem>>, vector<1x128xf32>,
    } else {
    }
    %c0 = arith.constant 0 : index
    %c0_1 = arith.constant 0 : index
    %3 = vector.load %arg1[%c0, %c0_1] : memref<8x128xf32, #tpu.memory_space<vmem>>, vector<8x128xf32>
    %c0_2 = arith.constant 0 : index
    %c0_3 = arith.constant 0 : index
    %4 = vector.load %arg3[%c0_2, %c0_3] : memref<2x128xf32, #tpu.memory_space<vmem>>, vector<2x128xf32>
    %c0_4 = arith.constant 0 : index
    %c0_5 = arith.constant 0 : index
    %5 = vector.load %arg2[%c0_4, %c0_5] : memref<1x128xi32, #tpu.memory_space<vmem>>, vector<1x128xi32>
    %cst = arith.constant dense<0xFF800000> : vector<128xf32>
    %6 = vector.multi_reduction <maximumf>, %3, %cst [0] : vector<8x128xf32> to vector<128xf32>
    %7 = vector.shape_cast %6 : vector<128xf32> to vector<1x128xf32>
    %8 = vector.broadcast %7 : vector<1x128xf32> to vector<8x128xf32>
    %9 = arith.subf %3, %8 : vector<8x128xf32>
    %10 = math.exp %9 : vector<8x128xf32>
    %cst_6 = arith.constant dense<0.000000e+00> : vector<128xf32>
    %11 = vector.multi_reduction <add>, %10, %cst_6 [0] : vector<8x128xf32> to vector<128xf32>
    %12 = vector.shape_cast %11 : vector<128xf32> to vector<1x128xf32>
    %13 = math.log %12 : vector<1x128xf32>
    %14 = arith.addf %7, %13 : vector<1x128xf32>
    %15 = tpu.iota {dimensions = array<i32: 0>} : vector<8x128xi32>
    %16 = vector.broadcast %5 : vector<1x128xi32> to vector<8x128xi32>
    %17 = arith.cmpi eq, %15, %16 : vector<8x128xi32>
    %18 = arith.extui %17 : vector<8x128xi1> to vector<8x128xi32>
    %19 = arith.sitofp %18 : vector<8x128xi32> to vector<8x128xf32>
    %20 = arith.mulf %3, %19 : vector<8x128xf32>
    %cst_7 = arith.constant dense<0.000000e+00> : vector<128xf32>
    %21 = vector.multi_reduction <add>, %20, %cst_7 [0] : vector<8x128xf32> to vector<128xf32>
    %22 = vector.shape_cast %21 : vector<128xf32> to vector<1x128xf32>
    %23 = arith.subf %14, %22 : vector<1x128xf32>
    %c0_8 = arith.constant 0 : index
    %c0_9 = arith.constant 0 : index
    %24 = vector.load %arg4[%c0_8, %c0_9] : memref<1x128xi32, #tpu.memory_space<vmem>>, vector<1x128xi32>
    %25 = vector.extract_strided_slice %4 {offsets = [0, 0], sizes = [1, 128], strides = [1, 1]} : vector<2x128xf32> to vector<1x128xf32>
    %26 = vector.extract_strided_slice %4 {offsets = [1, 0], sizes = [1, 128], strides = [1, 1]} : vector<2x128xf32> to vector<1x128xf32>
    %27 = arith.maximumf %25, %26 : vector<1x128xf32>
    %28 = arith.subf %25, %26 : vector<1x128xf32>
    %29 = math.absf %28 : vector<1x128xf32>
    %cst_10 = arith.constant 0.000000e+00 : f32
    %30 = vector.broadcast %cst_10 : f32 to vector<1x128xf32>
    %31 = arith.subf %30, %29 : vector<1x128xf32>
    %32 = math.exp %31 : vector<1x128xf32>
    %cst_11 = arith.constant 1.000000e+00 : f32
    %33 = vector.broadcast %cst_11 : f32 to vector<1x128xf32>
    %34 = arith.addf %33, %32 : vector<1x128xf32>
    %35 = math.log %34 : vector<1x128xf32>
    %36 = arith.addf %27, %35 : vector<1x128xf32>
    %c0_i32_12 = arith.constant 0 : i32
    %37 = vector.broadcast %c0_i32_12 : i32 to vector<1x128xi32>
    %38 = arith.cmpi eq, %24, %37 : vector<1x128xi32>
    %39 = arith.select %38, %25, %26 : vector<1x128xi1>, vector<1x128xf32>
    %40 = arith.subf %36, %39 : vector<1x128xf32>
    %41 = tpu.iota {dimensions = array<i32: 1>} : vector<1x128xi32>
    %c128_i32 = arith.constant 128 : i32
    %42 = arith.muli %arg0, %c128_i32 : i32
    %43 = vector.broadcast %42 : i32 to vector<1x128xi32>
    %44 = arith.addi %43, %41 : vector<1x128xi32>
    %c8_i32 = arith.constant 8 : i32
    %45 = vector.broadcast %c8_i32 : i32 to vector<1x128xi32>
    %46 = arith.cmpi slt, %44, %45 : vector<1x128xi32>
    %c0_13 = arith.constant 0 : index
    %c0_14 = arith.constant 0 : index
    %47 = vector.load %arg6[%c0_13, %c0_14] : memref<1x128xf32, #tpu.memory_space<vmem>>, vector<1x128xf32>
    %48 = arith.addf %23, %40 : vector<1x128xf32>
    %cst_15 = arith.constant 0.000000e+00 : f32
    %49 = vector.broadcast %cst_15 : f32 to vector<1x128xf32>
    %50 = arith.select %46, %48, %49 : vector<1x128xi1>, vector<1x128xf32>
    %51 = arith.addf %47, %50 : vector<1x128xf32>
    %c0_16 = arith.constant 0 : index
    %c0_17 = arith.constant 0 : index
    %52 = vector.load %arg6[%c0_16, %c0_17] : memref<1x128xf32, #tpu.memory_space<vmem>>, vector<1x128xf32>
    tpu.vector_store %arg6[%c0_16, %c0_17], %51 {strides = array<i32>} : memref<1x128xf32, #tpu.memory_space<vmem>>, vector<1x128xf32>,
    %c0_i32_18 = arith.constant 0 : i32
    %53 = arith.cmpi eq, %arg0, %c0_i32_18 : i32
    %54 = arith.extui %53 : i1 to i32
    %c0_i32_19 = arith.constant 0 : i32
    %55 = arith.cmpi ne, %54, %c0_i32_19 : i32
    scf.if %55 {
      %c0_20 = arith.constant 0 : index
      %c0_21 = arith.constant 0 : index
      %56 = vector.load %arg6[%c0_20, %c0_21] : memref<1x128xf32, #tpu.memory_space<vmem>>, vector<1x128xf32>
      %57 = vector.shape_cast %56 : vector<1x128xf32> to vector<1x1x128xf32>
      %cst_22 = arith.constant dense<0.000000e+00> : vector<1xf32>
      %58 = vector.multi_reduction <add>, %57, %cst_22 [1, 2] : vector<1x1x128xf32> to vector<1xf32>
      %59 = vector.shape_cast %58 : vector<1xf32> to vector<1x1x1xf32>
      %60 = vector.extract %59[0, 0, 0] : f32 from vector<1x1x1xf32>
      %cst_23 = arith.constant 1.250000e-01 : f32
      %61 = arith.mulf %60, %cst_23 : f32
      %c0_24 = arith.constant 0 : index
      %c0_25 = arith.constant 0 : index
      %62 = memref.load %arg5[%c0_24, %c0_25] : memref<1x1xf32, #tpu.memory_space<smem>>
      memref.store %61, %arg5[%c0_24, %c0_25] : memref<1x1xf32, #tpu.memory_space<smem>>
    } else {
    }
    return
  }
  func.func @transform_0(%arg0: i32) -> (i32, i32) {
    %c0_i32 = arith.constant 0 : i32
    %c0_i32_0 = arith.constant 0 : i32
    return %c0_i32, %arg0 : i32, i32
  }
  func.func @transform_1(%arg0: i32) -> (i32, i32) {
    %c0_i32 = arith.constant 0 : i32
    %c0_i32_0 = arith.constant 0 : i32
    return %c0_i32, %arg0 : i32, i32
  }
  func.func @transform_2(%arg0: i32) -> (i32, i32) {
    %c0_i32 = arith.constant 0 : i32
    %c0_i32_0 = arith.constant 0 : i32
    return %c0_i32, %arg0 : i32, i32
  }
  func.func @transform_3(%arg0: i32) -> (i32, i32) {
    %c0_i32 = arith.constant 0 : i32
    %c0_i32_0 = arith.constant 0 : i32
    return %c0_i32, %arg0 : i32, i32
  }
  func.func @transform_4(%arg0: i32) -> (i32, i32) {
    %c0_i32 = arith.constant 0 : i32
    %c0_i32_0 = arith.constant 0 : i32
    %c0_i32_1 = arith.constant 0 : i32
    return %c0_i32, %c0_i32_0 : i32, i32
  }
}

</mosaic_0001>

<bundles_post_ra>
// kernel: tpu_custom_call.1
= control target key start
LH: loop header
LB: loop body
LE: loop exit
PB: predicated region body
PF: predicated region fallthrough
CT: control target
= control target key end

     0   :  { %9 = vsyncpa [#allocation4], 0  ;;  %s241_s0 = inlined_call_operand.hbm [shape: f32[8,128], index: 0, kind: input, shape index: {}]   ;;  %s242_s1 = inlined_call_operand.vmem [shape: s32[1,128], index: 1, kind: input, shape index: {}]   ;;  %s243_s2 = inlined_call_operand.vmem [shape: f32[2,128], index: 2, kind: input, shape index: {}]   ;;  %s244_s3 = inlined_call_operand.vmem [shape: s32[1,128], index: 3, kind: input, shape index: {}]   ;;  %s245_s4 = inlined_call_operand.hbm [shape: f32[1,1], index: 4, kind: output, shape index: {}]  }
   0x1   :  { %10 = vsyncpa [#allocation5], 0  ;;  %s197_s15 = smov [#allocation3]  }
   0x2   :  { %s17_s16 = sshll.u32 %s197_s15, 4  ;;  %s18_s16 = int_to_ptr.vmem [resolvable:$true] %s17_s16 }
   0x3   :  { %s173_s17 = scalar_lea.vmem %s18_s16, 128  ;;  %p178_p1 = scmp.lt.s32.totalorder %s18_s16, %s18_s16 }
   0x4   :  { %p174_p0 = scmp.ne.s32.totalorder %s18_s16, %s173_s17  ;;  %p179_p2 = scmp.lt.s32.totalorder %s173_s17, %s173_s17 }
   0x6   :  { %p180_p3 = por %p179_p2, %p178_p1 }
   0x8   :  { %p181_p4 = pnand %p180_p3, %p174_p0 }
   0xa   :  { %184 = shalt.err (!%p181_p4)
}
   0xb   :  { %20 = dma.hbm_to_vmem [thread:$0]  %s241_s0, 128, %s18_s16, [#allocation4]  }
   0xc   :  { %193 = dma.done.wait [#allocation4], 128  }
   0xd   :  { %194 = vsyncadd [#allocation4], 4294967168  ;;  %v198_v0 = vmov 0.0   ;;  %v35_v1 = vld [vmem:[#allocation3] sm:$0xff]  ;;  %v56_v16 = vlaneseq  ;;  %v149_v18 = vld [vmem:[%s242_s1] ss:$0 sm:$0xff] }
   0xe   :  { %34 = vst [vmem:[#allocation2] sm:$0x1] %v198_v0  ;;  %v36_v2 = vld [vmem:[%s243_s2] sm:$0x3]  ;;  %v38_v3 = vrot.slane %v35_v1, 4  ;;  %vm121_vm3 = vcmask 1040384  }
   0xf   :  { %v75_v4 = vrot.slane %v36_v2, 1  ;;  %v57_v17 = vshrl.u32 %v56_v16, 7  ;;  %v199_v24 = vmov 1966171168   ;;  %v73_v41 = vld [vmem:[%s244_s3] sm:$0x1] }
  0x10   :  { %v39_v5 = vmax.f32 %v35_v1, %v38_v3  ;;  %v89_v25 = vunpack.c.l.s4 %v199_v24  ;;  %vm87_vm1 = vcmp.eq.s32.totalorder %v73_v41, 0  ;;  %v107_v51 = vand.u32 127, %v56_v16  ;;  %s200_s24 = smov [#allocation6]  }
  0x11   :  { %v78_v6 = vsub.f32 %v36_v2, %v75_v4  ;;  %vm62_vm0 = vcmp.eq.s32.totalorder %v57_v17, %v149_v18  ;;  %v77_v42 = vmax.f32 %v36_v2, %v75_v4 }
  0x12   :  { %v40_v7 = vrot.slane %v39_v5, 2  ;;  %v150_v21 = vsel %vm62_vm0, 1.0, %v198_v0  ;;  %v90_v29 = vunpack.c.0.s8 %v89_v25  ;;  %vm111_vm2 = vcmp.lt.s32.totalorder %v107_v51, 8 }
  0x13   :  { %v79_v8 = vand.u32 2147483647, %v78_v6  ;;  %v65_v27 = vmul.f32 %v150_v21, %v35_v1 }
  0x14   :  { %v41_v9 = vmax.f32 %v39_v5, %v40_v7  ;;  %v93_v33 = vsub.s32 %v90_v29, %v57_v17 }
  0x15   :  { %v80_v10 = vsub.f32 0.0, %v79_v8  ;;  %v66_v31 = vrot.slane %v65_v27, 4  ;;  %v112_v55 = vld [vmem:[#allocation2] sm:$0x1] }
  0x16   :  { %v42_v11 = vrot.slane %v41_v9, 1  ;;  %v94_v36 = vrot.slane %v36_v2, %v93_v33 }
  0x17   :  { %v81_v13 = vmul.f32 1.442695, %v80_v10  ;;  %v67_v35 = vadd.f32 %v66_v31, %v65_v27 }
  0x18   :  { %v43_v12 = vmax.f32 %v41_v9, %v42_v11  ;;  %v95_v39 = vcombine.high %v94_v36, %v94_v36 }
  0x19   :  { %157 = vpow2.f32 %v81_v13  ;;  %v68_v37 = vrot.slane %v67_v35, 2 }
  0x1a   :  { %v44_v14 = vsub.f32 %v35_v1, %v43_v12  ;;  %v102_v44 = vrot.slane %v95_v39, %v93_v33 }
  0x1b   :  { %v69_v40 = vadd.f32 %v68_v37, %v67_v35 }
  0x1c   :  { %v45_v15 = vmul.f32 1.442695, %v44_v14  ;;  %v104_v48 = vsel %vm87_vm1, %v36_v2, %v102_v44 }
  0x1d   :  { %v70_v45 = vrot.slane %v69_v40, 1 }
  0x1e   :  { %159 = vpow2.f32 %v45_v15 }
  0x1f   :  { %v71_v50 = vadd.f32 %v70_v45, %v69_v40 }
  0x26   :  { %v158_v19 = vpop.eup %157 }
  0x27   :  { %v83_v23 = vadd.f32 1.0, %v158_v19 }
  0x29   :  { %161 = vlog2.f32 %v83_v23 }
  0x2b   :  { %v160_v20 = vpop.eup %159 }
  0x2c   :  { %v47_v22 = vrot.slane %v160_v20, 4 }
  0x2e   :  { %v48_v26 = vadd.f32 %v160_v20, %v47_v22 }
  0x30   :  { %v49_v28 = vrot.slane %v48_v26, 2 }
  0x32   :  { %v50_v30 = vadd.f32 %v49_v28, %v48_v26 }
  0x34   :  { %v51_v32 = vrot.slane %v50_v30, 1 }
  0x36   :  { %v52_v34 = vadd.f32 %v51_v32, %v50_v30  ;;  %v162_v38 = vpop.eup %161 }
  0x37   :  { %v85_v43 = vmul.f32 0.6931472, %v162_v38 }
  0x38   :  { %163 = vlog2.f32 %v52_v34 }
  0x39   :  { %v86_v46 = vadd.f32 %v85_v43, %v77_v42 }
  0x3b   :  { %v105_v53 = vsub.f32 %v86_v46, %v104_v48 }
  0x45   :  { %v164_v47 = vpop.eup %163 }
  0x46   :  { %v54_v49 = vmul.f32 0.6931472, %v164_v47 }
  0x48   :  { %v55_v52 = vadd.f32 %v54_v49, %v43_v12 }
  0x4a   :  { %v72_v54 = vsub.f32 %v55_v52, %v71_v50 }
  0x4c   :  { %v113_v56 = vadd.f32 %v105_v53, %v72_v54 }
  0x4e   :  { %v114_v57 = vsel %vm111_vm2, %v113_v56, 0.0 }
  0x4f   :  { %v115_v58 = vadd.f32 %v114_v57, %v112_v55 }
  0x51   :  { %116 = vst [vmem:[#allocation2] sm:$0x1] %v115_v58 }
  0x58   :  { %v120_v59 = vld [vmem:[#allocation2] sm:$0x1] }
  0x59   :  { %v122_v60 = vsel %vm121_vm3, %v120_v59, 0.0 }
  0x5a   :  { %123 = vadd.xlane.f32.xlu0 %v122_v60 }
  0xe3   :  { %v124_v61 = vpop.xlane.xlu0 %123 }
  0xe4   :  { %v125_v62 = vrot.slane %v124_v61, 4 }
  0xe6   :  { %v126_v63 = vadd.f32 %v125_v62, %v124_v61 }
  0xe8   :  { %v127_v0 = vrot.slane %v126_v63, 2 }
  0xea   :  { %v128_v1 = vadd.f32 %v127_v0, %v126_v63 }
  0xec   :  { %v129_v2 = vrot.slane %v128_v1, 1 }
  0xee   :  { %v130_v3 = vadd.f32 %v129_v2, %v128_v1 }
  0xf0   :  { %151 = vpush %v130_v3 }
 0x121   :  { %s152_s3 = spop %151 }
 0x122   :  { %s132_s23 = smul.f32 0.125, %s152_s3 }
 0x124   :  { %134 = sst [smem:[#allocation6]] %s132_s23 }
 0x125   :  { %142 = dma.smem_to_hbm %s200_s24, 16, %s245_s4, [#allocation5]  }
 0x126   :  { %195 = dma.done.wait [#allocation5], 16  }
 0x127   :  { %196 = vsyncadd [#allocation5], 4294967280 }
 0x128   :  { %146 = sfence }
 0x129   :  { %147 = vsyncpa [#allocation4], 1 }
 0x12a   :  { %148 = vsyncpa [#allocation5], 1 }

</bundles_post_ra>
